<compile_context>
chip_gen: v5e
topology: v5e:2x2
jax: 0.10.0
libtpu: 0.0.40
codegen_flags: <defaults>
</compile_context>

<pallas_src>
import jax
import jax.numpy as jnp
from jax.experimental import pallas as pl
from jax.experimental.pallas import tpu as pltpu


def _bce_loss_kernel(x_ref, t_ref, m_ref, out_ref, bce_acc, mask_acc):
    ni = pl.program_id(1)

    @pl.when(ni == 0)
    def _():
        bce_acc[...] = jnp.zeros_like(bce_acc)
        mask_acc[...] = jnp.zeros_like(mask_acc)

    x = x_ref[...]
    t = t_ref[...]
    m = m_ref[...]

    # PyTorch F.binary_cross_entropy semantics: log terms clamped at -100.
    neg_log_p = -jnp.maximum(jnp.log(x), -100.0)        # -log(p),   target = 1
    neg_log_1mp = -jnp.maximum(jnp.log1p(-x), -100.0)   # -log(1-p), target = 0
    bce = (neg_log_p * t + neg_log_1mp * (1.0 - t)) * m

    # Lane-preserving partial sums: fold the (TB, TN) tile into (TB, 128)
    # accumulators with pure VPU adds (128-aligned static slices). The
    # expensive cross-lane reduction only happens once per row below.
    tn = x_ref.shape[1]
    b_part = bce_acc[...]
    m_part = mask_acc[...]
    for c in range(tn // 128):
        sl = slice(c * 128, (c + 1) * 128)
        b_part = b_part + bce[:, sl]
        m_part = m_part + m[:, sl]
    bce_acc[...] = b_part
    mask_acc[...] = m_part

    @pl.when(ni == pl.num_programs(1) - 1)
    def _():
        row_bce = jnp.sum(bce_acc[...], axis=-1, keepdims=True)
        row_msk = jnp.sum(mask_acc[...], axis=-1, keepdims=True)
        out_ref[...] = row_bce / row_msk


def my_bce_loss(inputs, targets, mask, *, tb=None, tn=None):
    """Pallas TPU MyBCELoss.forward (sample_weight/class_weight unused, as in reference)."""
    B, N = inputs.shape

    # Tile choice: lane dim >=128 and a multiple of 128, sublane multiple of 8.
    # 3 inputs x 2 pipeline buffers x (TB*TN*4B) <= 6 MiB at the (256, 1024)
    # cap -> safe under v5e's 16 MiB / v7x's 32 MiB scoped-VMEM defaults.
    if tn is None:
        tn = 128 * max(1, min(pl.cdiv(N, 128), 8))    # up to 1024 lanes
    if tb is None:
        tb = 8 * max(1, min(pl.cdiv(B, 8), 32))       # up to 256 rows

    # Pad to tile multiples. Padded mask is 0 so padded columns contribute
    # nothing to either sum; padded rows are sliced off before the batch mean.
    bp = pl.cdiv(B, tb) * tb
    np_ = pl.cdiv(N, tn) * tn
    if (bp, np_) != (B, N):
        pad = ((0, bp - B), (0, np_ - N))
        inputs = jnp.pad(inputs, pad, constant_values=0.5)
        targets = jnp.pad(targets, pad)
        mask = jnp.pad(mask, pad)

    grid = (bp // tb, np_ // tn)

    row_loss = pl.pallas_call(
        _bce_loss_kernel,
        out_shape=jax.ShapeDtypeStruct((bp, 1), jnp.float32),
        grid_spec=pltpu.PrefetchScalarGridSpec(
            num_scalar_prefetch=0,
            grid=grid,
            in_specs=[
                pl.BlockSpec((tb, tn), lambda bi, ni: (bi, ni)),
                pl.BlockSpec((tb, tn), lambda bi, ni: (bi, ni)),
                pl.BlockSpec((tb, tn), lambda bi, ni: (bi, ni)),
            ],
            out_specs=pl.BlockSpec((tb, 1), lambda bi, ni: (bi, 0)),
            scratch_shapes=[
                pltpu.VMEM((tb, 128), jnp.float32),
                pltpu.VMEM((tb, 128), jnp.float32),
            ],
        ),
        compiler_params=pltpu.CompilerParams(
            dimension_semantics=("parallel", "arbitrary")),
    )(inputs, targets, mask)

    # Final batch mean in the wrapper: keeps the batch grid axis parallel
    # (megacore sharding) and avoids serializing through one scalar.
    return jnp.mean(row_loss[:B, 0])


if __name__ == "__main__":
    key = jax.random.PRNGKey(0)
    k1, k2, k3 = jax.random.split(key, 3)

    # Small, deliberately non-aligned shapes; small tile override exercises the
    # padded remainder tiles and multi-step N accumulation path.
    B, N = 10, 200
    # probabilities in (0, 1), like sigmoid outputs fed to F.binary_cross_entropy
    inputs = jax.nn.sigmoid(jax.random.normal(k1, (B, N), dtype=jnp.float32))
    targets = (jax.random.uniform(k2, (B, N)) > 0.5).astype(jnp.float32)
    mask = (jax.random.uniform(k3, (B, N)) > 0.3).astype(jnp.float32)
    # guarantee no row has an all-zero mask (avoid 0/0, same as a sane PyTorch input)
    mask = mask.at[:, 0].set(1.0)

    loss = jax.block_until_ready(my_bce_loss(inputs, targets, mask, tb=8, tn=128))

    # pure-JAX reference (PyTorch binary_cross_entropy semantics) for sanity
    neg_log_p = -jnp.maximum(jnp.log(inputs), -100.0)
    neg_log_1mp = -jnp.maximum(jnp.log1p(-inputs), -100.0)
    bce = neg_log_p * targets + neg_log_1mp * (1.0 - targets)
    bce = bce * mask
    ref = jnp.mean(jnp.sum(bce, axis=1) / jnp.sum(mask, axis=1))

    assert jnp.allclose(loss, ref, rtol=1e-5, atol=1e-5), (loss, ref)
    print("KERNEL_OK")
</pallas_src>

<mosaic_0001>
module attributes {stable_mosaic.version = 11 : i64} {
  func.func @_bce_loss_kernel(%arg0: i32, %arg1: i32, %arg2: memref<8x128xf32, #tpu.memory_space<vmem>>, %arg3: memref<8x128xf32, #tpu.memory_space<vmem>>, %arg4: memref<8x128xf32, #tpu.memory_space<vmem>>, %arg5: memref<8x1xf32, #tpu.memory_space<vmem>>, %arg6: memref<8x128xf32, #tpu.memory_space<vmem>>, %arg7: memref<8x128xf32, #tpu.memory_space<vmem>>) attributes {dimension_semantics = [#tpu.dimension_semantics<parallel>, #tpu.dimension_semantics<arbitrary>], iteration_bounds = array<i64: 2, 2>, scalar_prefetch = 0 : i64, scratch_operands = 2 : i64, tpu.core_type = #tpu.core_type<tc>, window_params = [{transform_indices = @transform_0, window_bounds = array<i64: 8, 128>}, {transform_indices = @transform_1, window_bounds = array<i64: 8, 128>}, {transform_indices = @transform_2, window_bounds = array<i64: 8, 128>}, {transform_indices = @transform_3, window_bounds = array<i64: 8, 1>}]} {
    %c0_i32 = arith.constant 0 : i32
    %0 = arith.cmpi eq, %arg1, %c0_i32 : i32
    %1 = arith.extui %0 : i1 to i32
    %c0_i32_0 = arith.constant 0 : i32
    %2 = arith.cmpi ne, %1, %c0_i32_0 : i32
    scf.if %2 {
      %cst_20 = arith.constant 0.000000e+00 : f32
      %33 = vector.broadcast %cst_20 : f32 to vector<8x128xf32>
      %c0_21 = arith.constant 0 : index
      %c0_22 = arith.constant 0 : index
      %34 = vector.load %arg6[%c0_21, %c0_22] : memref<8x128xf32, #tpu.memory_space<vmem>>, vector<8x128xf32>
      tpu.vector_store %arg6[%c0_21, %c0_22], %33 {strides = array<i32>} : memref<8x128xf32, #tpu.memory_space<vmem>>, vector<8x128xf32>,
      %cst_23 = arith.constant 0.000000e+00 : f32
      %35 = vector.broadcast %cst_23 : f32 to vector<8x128xf32>
      %c0_24 = arith.constant 0 : index
      %c0_25 = arith.constant 0 : index
      %36 = vector.load %arg7[%c0_24, %c0_25] : memref<8x128xf32, #tpu.memory_space<vmem>>, vector<8x128xf32>
      tpu.vector_store %arg7[%c0_24, %c0_25], %35 {strides = array<i32>} : memref<8x128xf32, #tpu.memory_space<vmem>>, vector<8x128xf32>,
    } else {
    }
    %c0 = arith.constant 0 : index
    %c0_1 = arith.constant 0 : index
    %3 = vector.load %arg2[%c0, %c0_1] : memref<8x128xf32, #tpu.memory_space<vmem>>, vector<8x128xf32>
    %c0_2 = arith.constant 0 : index
    %c0_3 = arith.constant 0 : index
    %4 = vector.load %arg3[%c0_2, %c0_3] : memref<8x128xf32, #tpu.memory_space<vmem>>, vector<8x128xf32>
    %c0_4 = arith.constant 0 : index
    %c0_5 = arith.constant 0 : index
    %5 = vector.load %arg4[%c0_4, %c0_5] : memref<8x128xf32, #tpu.memory_space<vmem>>, vector<8x128xf32>
    %6 = math.log %3 : vector<8x128xf32>
    %cst = arith.constant -1.000000e+02 : f32
    %7 = vector.broadcast %cst : f32 to vector<8x128xf32>
    %8 = arith.maximumf %6, %7 : vector<8x128xf32>
    %cst_6 = arith.constant 0.000000e+00 : f32
    %9 = vector.broadcast %cst_6 : f32 to vector<8x128xf32>
    %10 = arith.subf %9, %8 : vector<8x128xf32>
    %cst_7 = arith.constant 0.000000e+00 : f32
    %11 = vector.broadcast %cst_7 : f32 to vector<8x128xf32>
    %12 = arith.subf %11, %3 : vector<8x128xf32>
    %13 = math.log1p %12 : vector<8x128xf32>
    %cst_8 = arith.constant -1.000000e+02 : f32
    %14 = vector.broadcast %cst_8 : f32 to vector<8x128xf32>
    %15 = arith.maximumf %13, %14 : vector<8x128xf32>
    %cst_9 = arith.constant 0.000000e+00 : f32
    %16 = vector.broadcast %cst_9 : f32 to vector<8x128xf32>
    %17 = arith.subf %16, %15 : vector<8x128xf32>
    %18 = arith.mulf %10, %4 : vector<8x128xf32>
    %cst_10 = arith.constant 1.000000e+00 : f32
    %19 = vector.broadcast %cst_10 : f32 to vector<8x128xf32>
    %20 = arith.subf %19, %4 : vector<8x128xf32>
    %21 = arith.mulf %17, %20 : vector<8x128xf32>
    %22 = arith.addf %18, %21 : vector<8x128xf32>
    %23 = arith.mulf %22, %5 : vector<8x128xf32>
    %c0_11 = arith.constant 0 : index
    %c0_12 = arith.constant 0 : index
    %24 = vector.load %arg6[%c0_11, %c0_12] : memref<8x128xf32, #tpu.memory_space<vmem>>, vector<8x128xf32>
    %c0_13 = arith.constant 0 : index
    %c0_14 = arith.constant 0 : index
    %25 = vector.load %arg7[%c0_13, %c0_14] : memref<8x128xf32, #tpu.memory_space<vmem>>, vector<8x128xf32>
    %26 = arith.addf %24, %23 : vector<8x128xf32>
    %27 = arith.addf %25, %5 : vector<8x128xf32>
    %c0_15 = arith.constant 0 : index
    %c0_16 = arith.constant 0 : index
    %28 = vector.load %arg6[%c0_15, %c0_16] : memref<8x128xf32, #tpu.memory_space<vmem>>, vector<8x128xf32>
    tpu.vector_store %arg6[%c0_15, %c0_16], %26 {strides = array<i32>} : memref<8x128xf32, #tpu.memory_space<vmem>>, vector<8x128xf32>,
    %c0_17 = arith.constant 0 : index
    %c0_18 = arith.constant 0 : index
    %29 = vector.load %arg7[%c0_17, %c0_18] : memref<8x128xf32, #tpu.memory_space<vmem>>, vector<8x128xf32>
    tpu.vector_store %arg7[%c0_17, %c0_18], %27 {strides = array<i32>} : memref<8x128xf32, #tpu.memory_space<vmem>>, vector<8x128xf32>,
    %c1_i32 = arith.constant 1 : i32
    %30 = arith.cmpi eq, %arg1, %c1_i32 : i32
    %31 = arith.extui %30 : i1 to i32
    %c0_i32_19 = arith.constant 0 : i32
    %32 = arith.cmpi ne, %31, %c0_i32_19 : i32
    scf.if %32 {
      %c0_20 = arith.constant 0 : index
      %c0_21 = arith.constant 0 : index
      %33 = vector.load %arg6[%c0_20, %c0_21] : memref<8x128xf32, #tpu.memory_space<vmem>>, vector<8x128xf32>
      %cst_22 = arith.constant dense<0.000000e+00> : vector<8xf32>
      %34 = vector.multi_reduction <add>, %33, %cst_22 [1] : vector<8x128xf32> to vector<8xf32>
      %35 = vector.shape_cast %34 : vector<8xf32> to vector<8x1xf32>
      %c0_23 = arith.constant 0 : index
      %c0_24 = arith.constant 0 : index
      %36 = vector.load %arg7[%c0_23, %c0_24] : memref<8x128xf32, #tpu.memory_space<vmem>>, vector<8x128xf32>
      %cst_25 = arith.constant dense<0.000000e+00> : vector<8xf32>
      %37 = vector.multi_reduction <add>, %36, %cst_25 [1] : vector<8x128xf32> to vector<8xf32>
      %38 = vector.shape_cast %37 : vector<8xf32> to vector<8x1xf32>
      %39 = arith.divf %35, %38 : vector<8x1xf32>
      %c0_26 = arith.constant 0 : index
      %c0_27 = arith.constant 0 : index
      %40 = vector.load %arg5[%c0_26, %c0_27] : memref<8x1xf32, #tpu.memory_space<vmem>>, vector<8x1xf32>
      tpu.vector_store %arg5[%c0_26, %c0_27], %39 {strides = array<i32>} : memref<8x1xf32, #tpu.memory_space<vmem>>, vector<8x1xf32>,
    } else {
    }
    return
  }
  func.func @transform_0(%arg0: i32, %arg1: i32) -> (i32, i32) {
    %c0_i32 = arith.constant 0 : i32
    return %arg0, %arg1 : i32, i32
  }
  func.func @transform_1(%arg0: i32, %arg1: i32) -> (i32, i32) {
    %c0_i32 = arith.constant 0 : i32
    return %arg0, %arg1 : i32, i32
  }
  func.func @transform_2(%arg0: i32, %arg1: i32) -> (i32, i32) {
    %c0_i32 = arith.constant 0 : i32
    return %arg0, %arg1 : i32, i32
  }
  func.func @transform_3(%arg0: i32, %arg1: i32) -> (i32, i32) {
    %c0_i32 = arith.constant 0 : i32
    %c0_i32_0 = arith.constant 0 : i32
    return %arg0, %c0_i32 : i32, i32
  }
}

</mosaic_0001>

<bundles_post_ra>
// kernel: tpu_custom_call.1
= control target key start
LH: loop header
LB: loop body
LE: loop exit
PB: predicated region body
PF: predicated region fallthrough
CT: control target
= control target key end

     0   :  { %s916_s0 = inlined_call_operand.hbm [shape: f32[16,256], index: 0, kind: input, shape index: {}]   ;;  %s917_s1 = inlined_call_operand.hbm [shape: f32[16,256], index: 1, kind: input, shape index: {}]   ;;  %s918_s2 = inlined_call_operand.hbm [shape: f32[16,256], index: 2, kind: input, shape index: {}]   ;;  %s919_s3 = inlined_call_operand.vmem [shape: f32[16,1], index: 3, kind: output, shape index: {}]  }
   0x1   :  { %923 = sst [smem:[#allocation13_spill]] %s917_s1 }
   0x2   :  { %8 = vsyncpa [#allocation5], 0 }
   0x3   :  { %10 = vsyncpa [#allocation5 + $0x1], 0 }
   0x4   :  { %11 = vsyncpa [#allocation7], 0 }
   0x5   :  { %13 = vsyncpa [#allocation7 + $0x1], 0  ;;  %s768_s12 = smov 0   ;;  %s770_s13 = smov 0  }
   0x6   :  { %s772_s14 = smov 0   ;;  %s774_s15 = smov 0  }
   0x7   :  { %s776_s16 = smov 0   ;;  %s778_s17 = smov 0  }
   0x8   :  { %s780_s18 = smov 0   ;;  %s782_s19 = smov 0  }
   0x9 LB: > { %s920_s20 = sadd.s32 4294967295, %s745_s19   ;;  %s28_s21 = sadd.s32 1, %s737_s17  ;;  %s745_s19 = sphi %s782_s19, %s19_s19   ;;  %s741_s18 = sphi %s780_s18, %s939_s18   ;;  %s737_s17 = sphi %s778_s17, %s938_s17   ;;  %s733_s16 = sphi %s776_s16, %s937_s16   ;;  %s729_s15 = sphi %s774_s15, %s936_s15   ;;  %s725_s14 = sphi %s772_s14, %s935_s14   ;;  %s721_s13 = sphi %s770_s13, %s934_s13   ;;  %s717_s12 = sphi %s768_s12, %s933_s12  }
   0xa   : > { %p29_p0 = scmp.ge.s32.totalorder %s28_s21, 2  ;;  %s31_s22 = sadd.s32 1, %s741_s18 }
   0xb   : > { %s40_s23 = sadd.s32 1, %s725_s14  ;;  %p47_p1 = scmp.ne.s32.totalorder %s725_s14, %s721_s13 }
   0xc   : > { %s941_s21 = smov (%p29_p0, %s28_s21), 0  ;;  %s943_s22 = smov (!%p29_p0, %s31_s22), %s741_s18 }
   0xd   : > { %924 = sst [smem:[#allocation11_spill]] %s941_s21  ;;  %s36_s24 = ssub.s32 %s737_s17, %s941_s21 }
   0xe   : > { %p48_p2 = scmp.eq.s32.totalorder %s745_s19, 0  ;;  %p33_p3 = scmp.ge.s32.totalorder %s943_s22, 2 }
   0xf   : > { %p53_p4 = scmp.ne.s32.totalorder %s721_s13, %s717_s12  ;;  %p54_p6 = scmp.eq.s32.totalorder %s920_s20, 0 }
  0x10   : > { %p49_p5 = por %p48_p2, %p47_p1  ;;  %s945_s22 = smov (%p33_p3, %s943_s22), 0 }
  0x11   : > { %925 = sst [smem:[#allocation12_spill]] %s945_s22  ;;  %p823_p7 = por %p54_p6, %p53_p4 }
  0x12   : > { %s35_s26 = ssub.s32 %s741_s18, %s945_s22  ;;  %p513_p8 = scmp.lt.s32.totalorder %s745_s19, 4 }
  0x13   : > { %s37_s27 = sor.u32 %s36_s24, %s35_s26  ;;  %s159_s28 = sand.u32 1, %s725_s14  }
  0x14   : > { %p38_p9 = scmp.eq.s32.totalorder %s37_s27, 0  ;;  %s479_s29 = sshll.u32 %s159_s28, 3 }
  0x15   : > { %s480_s30 = sshll.u32 %s741_s18, 1  ;;  %p832_p10 = pnand %p513_p8, %p49_p5 }
  0x16   : > { %s837_s5 = scalar_select %p38_p9, %s725_s14, %s40_s23  }
  0x17   : > { %s167_s6 = sadd.s32 %s737_s17, %s480_s30  ;;  %s180_s8 = sand.u32 1, %s745_s19  }
  0x18   : > { %s481_s7 = sshll.u32 %s167_s6, 3  ;;  %s928_s1 = sld [smem:[#allocation13_spill]] }
  0x19   : > { %s184_s12 = scalar_lea.vmem [#allocation6], %s479_s29  ;;  %p488_p11 = scmp.ge.s32.totalorder %s745_s19, 1 }
  0x1a   : > { %s194_s24 = sshll.u32 %s184_s12, 4  ;;  %s181_s27 = scalar_lea.sflag [#allocation7], %s180_s8  ;;  %s195_s24 = int_to_ptr.vmem [resolvable:$true] %s194_s24 }
  0x1b   : > { %p220_p12 = scmp.lt.s32.totalorder %s745_s19, 5  ;;  %s169_s9 = scalar_lea.hbm %s916_s0, %s481_s7 }
  0x1c   : > { %s163_s10 = scalar_lea.vmem [#allocation4], %s479_s29  ;;  %s171_s20 = sshll.u32 %s169_s9, 4  ;;  %s172_s20 = int_to_ptr.hbm [resolvable:$true] %s171_s20 }
  0x1d   : > { %p848_p13 = pnand %p488_p11, %p220_p12  ;;  %s173_s12 = sshll.u32 %s163_s10, 4  ;;  %s174_s12 = int_to_ptr.vmem [resolvable:$true] %s173_s12 }
  0x1e   : > { %s190_s11 = scalar_lea.hbm %s928_s1, %s481_s7  ;;  %s205_s1 = scalar_lea.vmem [#allocation8], %s479_s29 }
  0x1f   : > { %s192_s26 = sshll.u32 %s190_s11, 4  ;;  %s160_s11 = scalar_lea.sflag [#allocation5], %s159_s28  ;;  %s193_s26 = int_to_ptr.hbm [resolvable:$true] %s192_s26 }
  0x20   : > { %509 = dma.hbm_to_vmem [thread:$0]  (!%p832_p10), %s193_s26, 128, %s195_s24, %s181_s27  }
  0x21   : > { %506 = dma.hbm_to_vmem [thread:$0]  (!%p832_p10), %s172_s20, 128, %s174_s12, %s160_s11  }
  0x22   : > { %s211_s26 = scalar_lea.hbm %s918_s2, %s481_s7  ;;  %s215_s22 = sshll.u32 %s205_s1, 4  ;;  %s216_s22 = int_to_ptr.vmem [resolvable:$true] %s215_s22 }
  0x23   : > { %s213_s21 = sshll.u32 %s211_s26, 4  ;;  %224 = sbr.rel (%p848_p13) target bundleno = 221 (0xdd), region = 32  ;;  %s214_s21 = int_to_ptr.hbm [resolvable:$true] %s213_s21 }
  0x24   : > { %512 = dma.hbm_to_vmem [thread:$0]  (!%p832_p10), %s214_s21, 128, %s216_s22, %s181_s27  }
  0x25   : > { %s226_s30 = sand.u32 (!%p848_p13), 1, %s721_s13  }
  0x26   : > { %s865_s28 = sshll.u32 (!%p848_p13), %s226_s30, 3  ;;  %s227_s20 = scalar_lea.sflag (!%p848_p13), [#allocation5], %s226_s30 }
  0x27   : > { %s230_s6 = scalar_lea.vmem (!%p848_p13), [#allocation4], %s865_s28 }
  0x28   : > { %708 = dma.done.wait (%p823_p7), %s227_s20, 128  }
  0x29   : > { %710 = vsyncadd (%p823_p7), %s227_s20, 4294967168  ;;  %s930_s1 = sadd.s32 4294967295, %s745_s19   ;;  %s240_s29 = scalar_lea.vmem [#allocation6], %s865_s28 }
  0x2a   : > { %s236_s21 = sand.u32 1, %s930_s1  }
  0x2b   : > { %s237_s22 = scalar_lea.sflag [#allocation7], %s236_s21 }
  0x2c   : > { %712 = dma.done.wait (%p823_p7), %s237_s22, 256  }
  0x2d   : > { %714 = vsyncadd (%p823_p7), %s237_s22, 4294967040  ;;  %p283_p0 = scmp.lt.s32.totalorder %s733_s16, 1  ;;  %s250_s9 = scalar_lea.vmem [#allocation8], %s865_s28 }
  0x2e   : > { %p493_p1 = scmp.ne.s32.totalorder %s729_s15, 0 }
  0x2f   : > { %s947_s16 = smov (!%p283_p0, %s733_s16), 1 }
  0x30   : > { %s492_s4 = sshll.u32 %s947_s16, 3  ;;  %290 = sbr.rel (%p493_p1) target bundleno = 56 (0x38), region = 48 }
  0x31   : > { %s884_s23 = scalar_lea.vmem %s919_s3, %s492_s4 }
  0x35   : > { %v747_v0 = vmov 0.0  }
  0x36   : > { %291 = vst [vmem:[#allocation2] sm:$0xff] %v747_v0 }
  0x37   : > { %292 = vst [vmem:[#allocation3] sm:$0xff] %v747_v0 }
  0x38 PF: > { %v293_v1 = vld [vmem:[%s230_s6] sm:$0xff]  ;;  %v294_v15 = vld [vmem:[%s240_s29] sm:$0xff]  ;;  %p494_p2 = scmp.ne.s32.totalorder %s729_s15, 1 }
  0x39   : > { %v295_v2 = vld [vmem:[%s250_s9] sm:$0xff]  ;;  %579 = vlog2.f32 %v293_v1  ;;  %v300_v3 = vsub.f32 0.0, %v293_v1  ;;  %v313_v20 = vsub.f32 1.0, %v294_v15 }
  0x3b   : > { %v301_v6 = vadd.f32 1.0, %v300_v3  ;;  %v304_v7 = vmul.f32 -0.5, %v300_v3  ;;  %v307_v10 = vand.u32 2147483647, %v300_v3 }
  0x3d   : > { %581 = vlog2.f32 %v301_v6  ;;  %v305_v8 = vadd.f32 1.0, %v304_v7  ;;  %vm308_vm0 = vcmp.lt.f32.partialorder %v307_v10, 0.0004427343  ;;  %v317_v25 = vld [vmem:[#allocation2] sm:$0xff] }
  0x3e   : > { %v318_v4 = vld [vmem:[#allocation3] sm:$0xff] }
  0x3f   : > { %v320_v5 = vadd.f32 %v318_v4, %v295_v2  ;;  %v580_v9 = vpop.eup %579  ;;  %v306_v13 = vmul.f32 %v305_v8, %v300_v3 }
  0x40   : > { %v297_v11 = vmul.f32 0.6931472, %v580_v9 }
  0x41   : > { %322 = vst [vmem:[#allocation3] sm:$0xff] %v320_v5 }
  0x42   : > { %v298_v12 = vmax.f32 %v297_v11, -100.0 }
  0x43   : > { %v582_v14 = vpop.eup %581 }
  0x44   : > { %v303_v16 = vmul.f32 0.6931472, %v582_v14  ;;  %v299_v17 = vsub.f32 0.0, %v298_v12 }
  0x46   : > { %v309_v18 = vsel %vm308_vm0, %v306_v13, %v303_v16  ;;  %v312_v22 = vmul.f32 %v299_v17, %v294_v15 }
  0x47   : > { %v310_v19 = vmax.f32 %v309_v18, -100.0 }
  0x49   : > { %v311_v21 = vsub.f32 0.0, %v310_v19 }
  0x4b   : > { %v314_v23 = vmul.f32 %v313_v20, %v311_v21 }
  0x4d   : > { %v315_v24 = vadd.f32 %v314_v23, %v312_v22 }
  0x4f   : > { %v316_v26 = vmul.f32 %v315_v24, %v295_v2  ;;  %326 = sbr.rel (%p494_p2) target bundleno = 221 (0xdd), region = 52 }
  0x51   : > { %v319_v27 = vadd.f32 %v317_v25, %v316_v26 }
  0x53   : > { %321 = vst [vmem:[#allocation2] sm:$0xff] %v319_v27 }
  0x54   : > { %v330_v28 = vld [vmem:[#allocation3] sm:$0xff]  ;;  %vm348_vm5 = vcmask 7168  }
  0x55   : > { %331 = vadd.xlane.f32.xlu0 %v330_v28 }
  0x5a   : > { %v327_v29 = vld [vmem:[#allocation2] sm:$0xff] }
  0x5d   : > { %328 = vadd.xlane.f32.xlu0 %v327_v29 }
  0xc8   : > { %v332_v30 = vpop.xlane.xlu0 %331 }
  0xc9   : > { %583 = vrcp.f32 %v332_v30  ;;  %v344_v34 = vand.u32 2147483648, %v332_v30  ;;  %v342_v36 = vand.u32 2147483647, %v332_v30  ;;  %vm338_vm2 = vweird.f32 %v332_v30 }
  0xcb   : > { %v345_v38 = vor.u32 1.1754944e-38, %v344_v34  ;;  %vm343_vm4 = vcmp.eq.f32.partialorder %v342_v36, 8.507059e+37 }
  0xcf   : > { %v584_v31 = vpop.eup %583 }
  0xd0   : > { %v334_v32 = vmul.f32 %v584_v31, %v332_v30  ;;  %vm339_vm1 = vweird.f32 %v584_v31  ;;  %v329_v39 = vpop.xlane.xlu0 %328 }
  0xd1   : > { %vm340_vm3 = vmor %vm338_vm2, %vm339_vm1 }
  0xd2   : > { %v335_v33 = vsub.f32 1.0, %v334_v32 }
  0xd4   : > { %v336_v35 = vmul.f32 %v584_v31, %v335_v33 }
  0xd6   : > { %v337_v37 = vadd.f32 %v584_v31, %v336_v35 }
  0xd8   : > { %v341_v40 = vsel %vm340_vm3, %v584_v31, %v337_v37 }
  0xd9   : > { %v346_v41 = vsel %vm343_vm4, %v345_v38, %v341_v40 }
  0xda   : > { %v347_v42 = vmul.f32 %v346_v41, %v329_v39 }
  0xdc   : > { %349 = vst.msk [vmem:[%s884_s23] sm:$0xff] %vm348_vm5, %v347_v42 }
  0xdd PF: > { %s19_s19 = sadd.s32 1, %s745_s19   ;;  %s931_s25 = sld [smem:[#allocation11_spill]] }
  0xde   : > { %p16_p3 = scmp.ge.s32.totalorder %s19_s19, 6   ;;  %s932_s10 = sld [smem:[#allocation12_spill]] }
  0xdf   : > { %s933_s12 = smov %s721_s13  ;;  %s934_s13 = smov %s725_s14 }
  0xe0   : > { %s935_s14 = smov %s837_s5  ;;  %s936_s15 = smov %s737_s17 }
  0xe1   : > { %s937_s16 = smov %s741_s18  ;;  %18 = sbr.rel (!%p16_p3) target bundleno = 9 (0x9), region = 104 }
  0xe3   : > { %s938_s17 = smov %s931_s25 }
  0xe4   : > { %s939_s18 = smov %s932_s10 }
  0xe6   :  { %369 = vsyncpa [#allocation5], 1 }
  0xe7   :  { %371 = vsyncpa [#allocation5 + $0x1], 1 }
  0xe8   :  { %372 = vsyncpa [#allocation7], 1 }
  0xe9   :  { %374 = vsyncpa [#allocation7 + $0x1], 1 }

</bundles_post_ra>
